<compile_context>
chip_gen: v5e
topology: v5e:2x2
jax: 0.10.0
libtpu: 0.0.40
codegen_flags: <defaults>
</compile_context>

<pallas_src>
import jax
import jax.numpy as jnp
from jax.experimental import pallas as pl
from jax.experimental.pallas import tpu as pltpu


def _vmem_capacity_bytes() -> int:
    """Physical VMEM of the local TPU generation (fallback: v7x's 64 MiB)."""
    try:
        return int(pltpu.get_tpu_info().vmem_capacity_bytes)
    except Exception:
        return 64 * 1024 * 1024


# --------------------------------------------------------------------------
# Full forward: prompts = cat([prefix, ctx, suffix], dim=1)
# --------------------------------------------------------------------------
def _prompt_concat_kernel(prefix_ref, ctx_ref, suffix_ref, out_ref):
    """Build prompts for a block of `c_blk` classes, flat (seq*D) lane layout.

    prefix_ref: (c_blk, D)          per-class SOS row
    ctx_ref:    (1, n_ctx * D)      shared context rows (resident across steps)
    suffix_ref: (c_blk, s_suf * D)  per-class class-name + EOS rows
    out_ref:    (c_blk, seq * D)

    D is a multiple of 128 for CLIP (512/768), so every lane offset below is
    128-aligned and every write spans full sublanes -> unmasked stores.
    """
    c_blk = out_ref.shape[0]
    d_pre = prefix_ref.shape[1]          # D
    d_ctx = ctx_ref.shape[1]             # n_ctx * D
    out_ref[:, 0:d_pre] = prefix_ref[...].astype(out_ref.dtype)
    out_ref[:, d_pre:d_pre + d_ctx] = jnp.broadcast_to(
        ctx_ref[...], (c_blk, d_ctx)).astype(out_ref.dtype)
    out_ref[:, d_pre + d_ctx:] = suffix_ref[...].astype(out_ref.dtype)


def vl_prompt_learner_forward(ctx, token_prefix, token_suffix,
                              *, class_block=None, vmem_limit_bytes=None):
    """JAX/Pallas equivalent of VLPromptLearner.forward().

    Args:
      ctx:          (n_ctx, ctx_dim)  learned context vectors
      token_prefix: (n_cls, 1, ctx_dim)
      token_suffix: (n_cls, seq - 1 - n_ctx, ctx_dim)
    Returns:
      prompts: (n_cls, seq, ctx_dim)
    """
    n_ctx, d = ctx.shape
    n_cls = token_prefix.shape[0]
    s_suf = token_suffix.shape[1]
    seq = 1 + n_ctx + s_suf
    dtype = ctx.dtype
    itemsize = jnp.dtype(dtype).itemsize

    # ---- generation-aware class-batch size -------------------------------
    # Per class, per pipeline buffer: prefix + suffix inputs and the full
    # seq-row output block.  BlockSpec double-buffers all of them, so budget
    # ~1/3 of physical VMEM for tiles; v7x (64 MiB) automatically gets ~half
    # the class block used on v5e/v6e (128 MiB).
    phys_vmem = _vmem_capacity_bytes()
    per_class_bytes = (seq + s_suf + 1) * d * itemsize
    if class_block is None:
        tile_budget = phys_vmem // 3
        class_block = max(1, min(n_cls, tile_budget // (2 * per_class_bytes), 1024))
    c_blk = int(class_block)
    # Keep partial-tiling constraints happy: block sublane dim must be a
    # multiple of the dtype's sublane packing, or the full class extent.
    sub = 8 * max(1, 4 // itemsize)
    if c_blk >= n_cls:
        c_blk = n_cls
    else:
        c_blk = min(n_cls, max(sub, (c_blk // sub) * sub))

    if vmem_limit_bytes is None:
        needed = (2 * c_blk * per_class_bytes
                  + 2 * n_ctx * d * itemsize + (8 << 20))
        vmem_limit_bytes = int(min(phys_vmem * 3 // 4, max(needed, 16 << 20)))

    # Flatten (seq, D) into the lane axis.  These reshapes are contiguous and
    # free on HBM; they are pure layout plumbing for lane-dense stores.
    prefix2d = token_prefix.reshape(n_cls, d)
    suffix2d = token_suffix.reshape(n_cls, s_suf * d)
    ctx2d = ctx.reshape(1, n_ctx * d)

    grid = (pl.cdiv(n_cls, c_blk),)
    grid_spec = pltpu.PrefetchScalarGridSpec(
        num_scalar_prefetch=0,
        grid=grid,
        in_specs=[
            # Per-class-block prefix rows.
            pl.BlockSpec((c_blk, d), lambda i: (i, 0)),
            # Shared ctx block: constant block index -> DMA'd once, resident.
            pl.BlockSpec((1, n_ctx * d), lambda i: (0, 0)),
            # Per-class-block suffix rows.
            pl.BlockSpec((c_blk, s_suf * d), lambda i: (i, 0)),
        ],
        out_specs=pl.BlockSpec((c_blk, seq * d), lambda i: (i, 0)),
    )

    out2d = pl.pallas_call(
        _prompt_concat_kernel,
        out_shape=jax.ShapeDtypeStruct((n_cls, seq * d), dtype),
        grid_spec=grid_spec,
        compiler_params=pltpu.CompilerParams(
            # "parallel" lets the class-block axis shard across v7x's two
            # TensorCores (no-op on single-core v5e/v6e).
            dimension_semantics=("parallel",),
            vmem_limit_bytes=int(vmem_limit_bytes),
        ),
    )(prefix2d, ctx2d, suffix2d)
    return out2d.reshape(n_cls, seq, d)


# --------------------------------------------------------------------------
# Fast path: prefix/suffix are frozen registered buffers, so between forward
# passes only the n_ctx learned ctx rows change.  Scatter them into a
# persistent prompts buffer in place (aliased input/output).
# --------------------------------------------------------------------------
def vl_prompt_learner_update_ctx(prompts, ctx, *, chunk_bytes=4 << 20):
    """In-place ctx refresh of a previously built (n_cls, seq, D) prompt buffer.

    `prompts` is aliased to the output, so prefix/suffix rows are never re-read
    or re-written; only n_cls * n_ctx * D elements of HBM write traffic occur.
    A single (chunk, n_ctx, D) VMEM broadcast of ctx is the source of every
    chunked HBM DMA (all classes receive identical rows), so VMEM use is tiny
    and all DMAs are issued before any wait (fully overlapped).
    """
    n_ctx, d = ctx.shape
    n_cls, seq, d2 = prompts.shape
    assert d2 == d and seq >= 1 + n_ctx
    dtype = prompts.dtype
    itemsize = jnp.dtype(dtype).itemsize

    per_class = n_ctx * d * itemsize
    cb = max(1, min(n_cls, chunk_bytes // max(1, per_class)))
    full = n_cls // cb
    rem = n_cls - full * cb
    n_dmas = full + (1 if rem else 0)

    def kernel(ctx_ref, prompts_in_hbm, prompts_out_hbm, bcast, sems):
        del prompts_in_hbm  # same HBM buffer as prompts_out_hbm (aliased)
        # Fill the broadcast buffer once; reuse it for every chunk's DMA.
        bcast[...] = jnp.broadcast_to(
            ctx_ref[...][None], bcast.shape).astype(bcast.dtype)
        copies = []
        for i in range(full):
            cp = pltpu.make_async_copy(
                bcast,
                prompts_out_hbm.at[pl.ds(i * cb, cb), pl.ds(1, n_ctx), :],
                sems.at[i])
            cp.start()
            copies.append(cp)
        if rem:
            cp = pltpu.make_async_copy(
                bcast.at[0:rem],
                prompts_out_hbm.at[pl.ds(full * cb, rem), pl.ds(1, n_ctx), :],
                sems.at[full])
            cp.start()
            copies.append(cp)
        for cp in copies:
            cp.wait()

    return pl.pallas_call(
        kernel,
        out_shape=jax.ShapeDtypeStruct(prompts.shape, dtype),
        in_specs=[
            pl.BlockSpec(memory_space=pltpu.MemorySpace.VMEM),  # ctx (small)
            pl.BlockSpec(memory_space=pl.ANY),                  # prompts (HBM)
        ],
        out_specs=pl.BlockSpec(memory_space=pl.ANY),
        scratch_shapes=[
            pltpu.VMEM((cb, n_ctx, d), dtype),
            pltpu.SemaphoreType.DMA((n_dmas,)),
        ],
        input_output_aliases={1: 0},
        compiler_params=pltpu.CompilerParams(has_side_effects=True),
    )(ctx, prompts)


if __name__ == "__main__":
    # Small synthetic shapes consistent with the module: n_cls classes, n_ctx
    # learned context tokens, total sequence length `seq`, embedding dim
    # ctx_dim (a multiple of 128 so stores stay lane-dense; real CLIP is
    # 512/768 with seq=77).
    n_cls, n_ctx, seq, ctx_dim = 8, 4, 16, 128
    s_suf = seq - 1 - n_ctx
    dtype = jnp.float32

    key = jax.random.PRNGKey(0)
    k_ctx, k_pre, k_suf, k_upd = jax.random.split(key, 4)

    # nn.init.normal_(ctx_vectors, std=0.02)
    ctx = (0.02 * jax.random.normal(k_ctx, (n_ctx, ctx_dim))).astype(dtype)
    # TODO(synk): real module derives prefix/suffix from clip_model.token_embedding
    # on tokenized class prompts (host-side __init__); here they are synthetic.
    token_prefix = jax.random.normal(k_pre, (n_cls, 1, ctx_dim)).astype(dtype)
    token_suffix = jax.random.normal(k_suf, (n_cls, s_suf, ctx_dim)).astype(dtype)

    def ref_forward(c):
        return jnp.concatenate(
            [token_prefix,
             jnp.broadcast_to(c[None], (n_cls, n_ctx, ctx_dim)),
             token_suffix],
            axis=1)

    # 1) Full forward (faithful to VLPromptLearner.forward()).
    prompts = jax.block_until_ready(
        vl_prompt_learner_forward(ctx, token_prefix, token_suffix))
    assert prompts.shape == (n_cls, seq, ctx_dim)
    assert jnp.array_equal(prompts, ref_forward(ctx))

    # 2) In-place fast path: ctx changed (e.g. after an optimizer step); only
    #    the n_ctx context rows of the persistent prompt buffer are rewritten.
    ctx_new = (ctx + 0.01 * jax.random.normal(k_upd, (n_ctx, ctx_dim))).astype(dtype)
    update = jax.jit(vl_prompt_learner_update_ctx, donate_argnums=(0,))
    prompts2 = jax.block_until_ready(update(prompts, ctx_new))
    assert prompts2.shape == (n_cls, seq, ctx_dim)
    assert jnp.array_equal(prompts2, ref_forward(ctx_new))

    print("KERNEL_OK")
</pallas_src>

<mosaic_0001>
module attributes {stable_mosaic.version = 11 : i64} {
  func.func @_prompt_concat_kernel(%arg0: i32, %arg1: memref<8x128xf32, #tpu.memory_space<vmem>>, %arg2: memref<1x512xf32, #tpu.memory_space<vmem>>, %arg3: memref<8x1408xf32, #tpu.memory_space<vmem>>, %arg4: memref<8x2048xf32, #tpu.memory_space<vmem>>) attributes {dimension_semantics = [#tpu.dimension_semantics<parallel>], iteration_bounds = array<i64: 1>, scalar_prefetch = 0 : i64, scratch_operands = 0 : i64, tpu.core_type = #tpu.core_type<tc>, window_params = [{transform_indices = @transform_0, window_bounds = array<i64: 8, 128>}, {pipeline_mode = #tpu.pipeline_mode<synchronous>, transform_indices = @transform_1, window_bounds = array<i64: 1, 512>}, {transform_indices = @transform_2, window_bounds = array<i64: 8, 1408>}, {transform_indices = @transform_3, window_bounds = array<i64: 8, 2048>}]} {
    %c0 = arith.constant 0 : index
    %c0_0 = arith.constant 0 : index
    %0 = vector.load %arg1[%c0, %c0_0] : memref<8x128xf32, #tpu.memory_space<vmem>>, vector<8x128xf32>
    %c0_1 = arith.constant 0 : index
    %c0_2 = arith.constant 0 : index
    %1 = vector.load %arg4[%c0_1, %c0_2] : memref<8x2048xf32, #tpu.memory_space<vmem>>, vector<8x128xf32>
    tpu.vector_store %arg4[%c0_1, %c0_2], %0 {strides = array<i32>} : memref<8x2048xf32, #tpu.memory_space<vmem>>, vector<8x128xf32>,
    %c0_3 = arith.constant 0 : index
    %c0_4 = arith.constant 0 : index
    %2 = vector.load %arg2[%c0_3, %c0_4] : memref<1x512xf32, #tpu.memory_space<vmem>>, vector<1x512xf32>
    %3 = vector.shape_cast %2 : vector<1x512xf32> to vector<1x512xf32>
    %4 = vector.broadcast %3 : vector<1x512xf32> to vector<8x512xf32>
    %c0_5 = arith.constant 0 : index
    %c128 = arith.constant 128 : index
    %5 = vector.load %arg4[%c0_5, %c128] : memref<8x2048xf32, #tpu.memory_space<vmem>>, vector<8x512xf32>
    tpu.vector_store %arg4[%c0_5, %c128], %4 {strides = array<i32>} : memref<8x2048xf32, #tpu.memory_space<vmem>>, vector<8x512xf32>,
    %c0_6 = arith.constant 0 : index
    %c0_7 = arith.constant 0 : index
    %6 = vector.load %arg3[%c0_6, %c0_7] : memref<8x1408xf32, #tpu.memory_space<vmem>>, vector<8x1408xf32>
    %c0_8 = arith.constant 0 : index
    %c640 = arith.constant 640 : index
    %7 = vector.load %arg4[%c0_8, %c640] : memref<8x2048xf32, #tpu.memory_space<vmem>>, vector<8x1408xf32>
    tpu.vector_store %arg4[%c0_8, %c640], %6 {strides = array<i32>} : memref<8x2048xf32, #tpu.memory_space<vmem>>, vector<8x1408xf32>,
    return
  }
  func.func @transform_0(%arg0: i32) -> (i32, i32) {
    %c0_i32 = arith.constant 0 : i32
    %c0_i32_0 = arith.constant 0 : i32
    return %arg0, %c0_i32 : i32, i32
  }
  func.func @transform_1(%arg0: i32) -> (i32, i32) {
    %c0_i32 = arith.constant 0 : i32
    %c0_i32_0 = arith.constant 0 : i32
    %c0_i32_1 = arith.constant 0 : i32
    return %c0_i32, %c0_i32_0 : i32, i32
  }
  func.func @transform_2(%arg0: i32) -> (i32, i32) {
    %c0_i32 = arith.constant 0 : i32
    %c0_i32_0 = arith.constant 0 : i32
    return %arg0, %c0_i32 : i32, i32
  }
  func.func @transform_3(%arg0: i32) -> (i32, i32) {
    %c0_i32 = arith.constant 0 : i32
    %c0_i32_0 = arith.constant 0 : i32
    return %arg0, %c0_i32 : i32, i32
  }
}

</mosaic_0001>

<bundles_post_ra>
// kernel: tpu_custom_call.1
= control target key start
LH: loop header
LB: loop body
LE: loop exit
PB: predicated region body
PF: predicated region fallthrough
CT: control target
= control target key end

     0   :  { %8 = vsyncpa [#allocation3], 0  ;;  %s254_s0 = inlined_call_operand.hbm [shape: f32[8,128], index: 0, kind: input, shape index: {}]   ;;  %s255_s1 = inlined_call_operand.hbm [shape: f32[1,512], index: 1, kind: input, shape index: {}]   ;;  %s256_s2 = inlined_call_operand.hbm [shape: f32[8,1408], index: 2, kind: input, shape index: {}]   ;;  %s257_s3 = inlined_call_operand.hbm [shape: f32[8,2048], index: 3, kind: output, shape index: {}]  }
   0x1   :  { %9 = vsyncpa [#allocation6], 0  ;;  %s27_s14 = sshll.u32 %s255_s1, 4  ;;  %s28_s14 = int_to_ptr.hbm [resolvable:$true] %s27_s14 }
   0x2   :  { %10 = vsyncpa [#allocation4], 0  ;;  %s218_s15 = smov [#allocation5]   ;;  %s16_s19 = sshll.u32 %s254_s0, 4  ;;  %s17_s19 = int_to_ptr.hbm [resolvable:$true] %s16_s19 }
   0x3   :  { %s29_s16 = sshll.u32 %s218_s15, 4  ;;  %s219_s20 = smov [#allocation2]   ;;  %s30_s16 = int_to_ptr.vmem [resolvable:$true] %s29_s16 }
   0x4   :  { %32 = dma.hbm_to_vmem [thread:$0]  %s28_s14, 64, %s30_s16, [#allocation6]  }
   0x5   :  { %s18_s21 = sshll.u32 %s219_s20, 4  ;;  %s38_s24 = sshll.u32 %s256_s2, 4  ;;  %s19_s21 = int_to_ptr.vmem [resolvable:$true] %s18_s21  ;;  %s39_s24 = int_to_ptr.hbm [resolvable:$true] %s38_s24 }
   0x6   :  { %21 = dma.hbm_to_vmem [thread:$0]  %s17_s19, 128, %s19_s21, [#allocation3]  }
   0x7   :  { %s220_s1 = smov [#allocation7]  }
   0x8   :  { %s40_s25 = sshll.u32 %s220_s1, 4  ;;  %s41_s25 = int_to_ptr.vmem [resolvable:$true] %s40_s25 }
   0x9   :  { %43 = dma.hbm_to_vmem [thread:$0]  %s39_s24, 1408, %s41_s25, [#allocation6]  }
   0xa   :  { %212 = dma.done.wait [#allocation3], 128  }
   0xb   :  { %213 = vsyncadd [#allocation3], 4294967168 }
   0xc   :  { %214 = dma.done.wait [#allocation6], 1472  }
   0xd   :  { %215 = vsyncadd [#allocation6], 4294965824  ;;  %v56_v0 = vld [vmem:[#allocation2] sm:$0xff]  ;;  %v58_v1 = vld [vmem:[#allocation5] sm:$0xf]  ;;  %s221_s0 = smov [#allocation8]  }
   0xe   :  { %v72_v2 = vld [vmem:[#allocation7] sm:$0xff]  ;;  %57 = vst [vmem:[#allocation8] sm:$0xff] %v56_v0  ;;  %v60_v3 = vperm.slane %v58_v1, 0  ;;  %v61_v4 = vperm.slane %v58_v1, 1  ;;  %v62_v5 = vperm.slane %v58_v1, 2  ;;  %v63_v6 = vperm.slane %v58_v1, 3 }
   0xf   :  { %83 = vst [vmem:[#allocation8 + $0x28] sm:$0xff] %v72_v2  ;;  %v73_v7 = vld [vmem:[#allocation7 + $0x8] sm:$0xff]  ;;  %v74_v8 = vld [vmem:[#allocation7 + $0x10] sm:$0xff]  ;;  %v75_v9 = vld [vmem:[#allocation7 + $0x18] sm:$0xff]  ;;  %s99_s2 = sshll.u32 %s221_s0, 4  ;;  %s101_s28 = sshll.u32 %s257_s3, 4  ;;  %s100_s2 = int_to_ptr.vmem [resolvable:$true] %s99_s2  ;;  %s102_s28 = int_to_ptr.hbm [resolvable:$true] %s101_s28 }
  0x10   :  { %68 = vst [vmem:[#allocation8 + $0x8] sm:$0xff] %v60_v3  ;;  %v76_v10 = vld [vmem:[#allocation7 + $0x20] sm:$0xff]  ;;  %v77_v11 = vld [vmem:[#allocation7 + $0x28] sm:$0xff]  ;;  %v78_v12 = vld [vmem:[#allocation7 + $0x30] sm:$0xff] }
  0x11   :  { %69 = vst [vmem:[#allocation8 + $0x10] sm:$0xff] %v61_v4  ;;  %v79_v13 = vld [vmem:[#allocation7 + $0x38] sm:$0xff]  ;;  %v80_v14 = vld [vmem:[#allocation7 + $0x40] sm:$0xff]  ;;  %v81_v15 = vld [vmem:[#allocation7 + $0x48] sm:$0xff] }
  0x12   :  { %70 = vst [vmem:[#allocation8 + $0x18] sm:$0xff] %v62_v5  ;;  %v82_v16 = vld [vmem:[#allocation7 + $0x50] sm:$0xff] }
  0x13   :  { %71 = vst [vmem:[#allocation8 + $0x20] sm:$0xff] %v63_v6 }
  0x14   :  { %84 = vst [vmem:[#allocation8 + $0x30] sm:$0xff] %v73_v7 }
  0x15   :  { %85 = vst [vmem:[#allocation8 + $0x38] sm:$0xff] %v74_v8 }
  0x16   :  { %86 = vst [vmem:[#allocation8 + $0x40] sm:$0xff] %v75_v9 }
  0x17   :  { %87 = vst [vmem:[#allocation8 + $0x48] sm:$0xff] %v76_v10 }
  0x18   :  { %88 = vst [vmem:[#allocation8 + $0x50] sm:$0xff] %v77_v11 }
  0x19   :  { %89 = vst [vmem:[#allocation8 + $0x58] sm:$0xff] %v78_v12 }
  0x1a   :  { %90 = vst [vmem:[#allocation8 + $0x60] sm:$0xff] %v79_v13 }
  0x1b   :  { %91 = vst [vmem:[#allocation8 + $0x68] sm:$0xff] %v80_v14 }
  0x1c   :  { %92 = vst [vmem:[#allocation8 + $0x70] sm:$0xff] %v81_v15 }
  0x1d   :  { %93 = vst [vmem:[#allocation8 + $0x78] sm:$0xff] %v82_v16 }
  0x1e   :  { %104 = dma.vmem_to_hbm [thread:$0]  %s100_s2, 2048, %s102_s28, [#allocation4]  }
  0x1f   :  { %216 = dma.done.wait [#allocation4], 2048  }
  0x20   :  { %217 = vsyncadd [#allocation4], 4294965248 }
  0x21   :  { %109 = vsyncpa [#allocation3], 1 }
  0x22   :  { %110 = vsyncpa [#allocation6], 1 }
  0x23   :  { %111 = vsyncpa [#allocation4], 1 }

</bundles_post_ra>
